<compile_context>
chip_gen: v7x
topology: tpu7x:2x2x1
jax: 0.10.0
libtpu: 0.0.40
codegen_flags: <defaults>
</compile_context>

<pallas_src>
import functools

import jax
import jax.numpy as jnp
from jax import lax
from jax.experimental import pallas as pl
from jax.experimental.pallas import tpu as pltpu


def _picie_kernel(p1_ref, p2_ref, o_ref, *, hw, tile, mask_cols):
    """Grid = (B, num_pixel_tiles).

    Block refs (batch dim squeezed away):
      p1_ref, p2_ref : (C, tile)  logits / target probs — class on sublanes, pixels on lanes
      o_ref          : (2, tile)  per-lane partial sums; row 0 = cross-entropy, row 1 = entropy.
                       Output block index is constant along the pixel-tile axis, so it stays
                       resident in VMEM and acts as the accumulator for this batch image.
    """
    t = pl.program_id(1)

    @pl.when(t == 0)
    def _():
        o_ref[...] = jnp.zeros_like(o_ref)

    x = p1_ref[...].astype(jnp.float32)   # (C, tile) logits
    q = p2_ref[...].astype(jnp.float32)   # (C, tile) target probabilities

    if mask_cols:
        # Last pixel tile may run past HW; zero out the out-of-range columns.
        col = t * tile + lax.broadcasted_iota(jnp.int32, (1, tile), 1)
        valid = col < hw                                  # (1, tile) bool
        x = jnp.where(valid, x, 0.0)
        q = jnp.where(valid, q, 0.0)

    # Numerically stable log-softmax along the class (sublane) axis.
    m = jnp.max(x, axis=0, keepdims=True)                 # (1, tile)
    z = x - m                                             # (C, tile)
    e = jnp.exp(z)                                        # (C, tile)
    s = jnp.sum(e, axis=0, keepdims=True)                 # (1, tile)
    logs = jnp.log(s)                                     # (1, tile)
    logp = z - logs                                       # log_softmax(pred1), (C, tile)

    # Per-pixel cross entropy:  -sum_c q * logp
    ce_cols = -jnp.sum(q * logp, axis=0, keepdims=True)   # (1, tile)
    # Per-pixel entropy of softmax(pred1):  -sum_c p*logp = log(s) - sum_c(e*z)/s
    ent_cols = logs - jnp.sum(e * z, axis=0, keepdims=True) * pl.reciprocal(s, approx=False)

    if mask_cols:
        ent_cols = ent_cols * valid.astype(jnp.float32)
        # ce_cols is already exactly zero on masked columns (q was zeroed above).

    o_ref[0:1, :] += ce_cols
    o_ref[1:2, :] += ent_cols


def picie_loss(pred1, pred2, lambda_entropy=0.1):
    """pred1, pred2: NCHW arrays of identical shape [B, C, H, W] (any float dtype)."""
    B, C, H, W = pred1.shape
    HW = H * W
    # Free reshape (collapse trailing contiguous dims) — no transpose, no HBM copy.
    x = pred1.reshape(B, C, HW)
    q = pred2.reshape(B, C, HW)

    # Pixel-tile size: multiple of 128 lanes, capped so one input block is <= ~2 MiB
    # (=> double-buffered working set of both inputs fits every generation's scoped VMEM).
    elem = jnp.dtype(pred1.dtype).itemsize
    max_tile = max(128, ((2 * 1024 * 1024) // max(1, C * elem)) // 128 * 128)
    tile = max(128, min(max_tile, 4096, ((HW + 127) // 128) * 128))
    grid_hw = (HW + tile - 1) // tile
    mask_cols = (HW % tile) != 0

    kernel = functools.partial(_picie_kernel, hw=HW, tile=tile, mask_cols=mask_cols)

    partials = pl.pallas_call(
        kernel,
        out_shape=jax.ShapeDtypeStruct((B, 2, tile), jnp.float32),
        grid_spec=pltpu.PrefetchScalarGridSpec(
            num_scalar_prefetch=0,
            grid=(B, grid_hw),
            in_specs=[
                pl.BlockSpec((None, C, tile), lambda b, t: (b, 0, t)),
                pl.BlockSpec((None, C, tile), lambda b, t: (b, 0, t)),
            ],
            out_specs=pl.BlockSpec((None, 2, tile), lambda b, t: (b, 0, 0)),
        ),
        compiler_params=pltpu.CompilerParams(
            # batch axis parallel (uses both TCs on v7x), pixel-tile axis is the
            # sequential accumulation axis.
            dimension_semantics=("parallel", "arbitrary"),
        ),
    )(x, q)

    n = jnp.float32(B * HW)
    ce = jnp.sum(partials[:, 0, :]) / n
    ent = jnp.sum(partials[:, 1, :]) / n
    return ce + lambda_entropy * ent


def picie_loss_ref(pred1, pred2, lambda_entropy=0.1):
    """Pure-JAX reference mirroring the PyTorch module."""
    logp = jax.nn.log_softmax(pred1.astype(jnp.float32), axis=1)
    p = jax.nn.softmax(pred1.astype(jnp.float32), axis=1)
    ce = jnp.mean(-jnp.sum(pred2.astype(jnp.float32) * logp, axis=1))
    ent = -jnp.mean(jnp.sum(p * logp, axis=1))
    return ce + lambda_entropy * ent


if __name__ == "__main__":
    key = jax.random.PRNGKey(0)
    k1, k2 = jax.random.split(key)

    B, C, H, W = 2, 8, 16, 16
    pred1 = jax.random.normal(k1, (B, C, H, W), dtype=jnp.float32)
    # pred2: soft cluster-assignment probabilities from the second augmentation.
    pred2 = jax.nn.softmax(jax.random.normal(k2, (B, C, H, W), dtype=jnp.float32), axis=1)

    loss = jax.jit(functools.partial(picie_loss, lambda_entropy=0.1))(pred1, pred2)
    loss = jax.block_until_ready(loss)

    ref = picie_loss_ref(pred1, pred2, lambda_entropy=0.1)
    assert jnp.allclose(loss, ref, rtol=1e-5, atol=1e-5), (loss, ref)

    print("KERNEL_OK")
</pallas_src>

<mosaic_0001>
module attributes {stable_mosaic.version = 11 : i64} {
  func.func @_picie_kernel(%arg0: i32, %arg1: i32, %arg2: memref<1x8x256xf32, #tpu.memory_space<vmem>>, %arg3: memref<1x8x256xf32, #tpu.memory_space<vmem>>, %arg4: memref<1x2x256xf32, #tpu.memory_space<vmem>>) attributes {dimension_semantics = [#tpu.dimension_semantics<parallel>, #tpu.dimension_semantics<arbitrary>], iteration_bounds = array<i64: 2, 1>, scalar_prefetch = 0 : i64, scratch_operands = 0 : i64, tpu.core_type = #tpu.core_type<tc>, window_params = [{transform_indices = @transform_0, window_bounds = array<i64: 1, 8, 256>}, {transform_indices = @transform_1, window_bounds = array<i64: 1, 8, 256>}, {transform_indices = @transform_2, window_bounds = array<i64: 1, 2, 256>}]} {
    %c0_i32 = arith.constant 0 : i32
    %0 = arith.cmpi eq, %arg1, %c0_i32 : i32
    %1 = arith.extui %0 : i1 to i32
    %c0_i32_0 = arith.constant 0 : i32
    %2 = arith.cmpi ne, %1, %c0_i32_0 : i32
    scf.if %2 {
      %cst_21 = arith.constant 0.000000e+00 : f32
      %40 = vector.broadcast %cst_21 : f32 to vector<2x256xf32>
      %c0_22 = arith.constant 0 : index
      %c0_23 = arith.constant 0 : index
      %c0_24 = arith.constant 0 : index
      %41 = vector.load %arg4[%c0_22, %c0_23, %c0_24] : memref<1x2x256xf32, #tpu.memory_space<vmem>>, vector<1x2x256xf32>
      %42 = vector.shape_cast %41 : vector<1x2x256xf32> to vector<2x256xf32>
      %43 = vector.shape_cast %40 : vector<2x256xf32> to vector<1x2x256xf32>
      tpu.vector_store %arg4[%c0_22, %c0_23, %c0_24], %43 {strides = array<i32>} : memref<1x2x256xf32, #tpu.memory_space<vmem>>, vector<1x2x256xf32>,
    } else {
    }
    %c0 = arith.constant 0 : index
    %c0_1 = arith.constant 0 : index
    %c0_2 = arith.constant 0 : index
    %3 = vector.load %arg2[%c0, %c0_1, %c0_2] : memref<1x8x256xf32, #tpu.memory_space<vmem>>, vector<1x8x256xf32>
    %4 = vector.shape_cast %3 : vector<1x8x256xf32> to vector<8x256xf32>
    %c0_3 = arith.constant 0 : index
    %c0_4 = arith.constant 0 : index
    %c0_5 = arith.constant 0 : index
    %5 = vector.load %arg3[%c0_3, %c0_4, %c0_5] : memref<1x8x256xf32, #tpu.memory_space<vmem>>, vector<1x8x256xf32>
    %6 = vector.shape_cast %5 : vector<1x8x256xf32> to vector<8x256xf32>
    %cst = arith.constant dense<0xFF800000> : vector<256xf32>
    %7 = vector.multi_reduction <maximumf>, %4, %cst [0] : vector<8x256xf32> to vector<256xf32>
    %8 = vector.shape_cast %7 : vector<256xf32> to vector<1x256xf32>
    %9 = vector.broadcast %8 : vector<1x256xf32> to vector<8x256xf32>
    %10 = arith.subf %4, %9 : vector<8x256xf32>
    %11 = math.exp %10 : vector<8x256xf32>
    %cst_6 = arith.constant dense<0.000000e+00> : vector<256xf32>
    %12 = vector.multi_reduction <add>, %11, %cst_6 [0] : vector<8x256xf32> to vector<256xf32>
    %13 = vector.shape_cast %12 : vector<256xf32> to vector<1x256xf32>
    %14 = math.log %13 : vector<1x256xf32>
    %15 = vector.broadcast %14 : vector<1x256xf32> to vector<8x256xf32>
    %16 = arith.subf %10, %15 : vector<8x256xf32>
    %17 = arith.mulf %6, %16 : vector<8x256xf32>
    %cst_7 = arith.constant dense<0.000000e+00> : vector<256xf32>
    %18 = vector.multi_reduction <add>, %17, %cst_7 [0] : vector<8x256xf32> to vector<256xf32>
    %19 = vector.shape_cast %18 : vector<256xf32> to vector<1x256xf32>
    %cst_8 = arith.constant 0.000000e+00 : f32
    %20 = vector.broadcast %cst_8 : f32 to vector<1x256xf32>
    %21 = arith.subf %20, %19 : vector<1x256xf32>
    %22 = arith.mulf %11, %10 : vector<8x256xf32>
    %cst_9 = arith.constant dense<0.000000e+00> : vector<256xf32>
    %23 = vector.multi_reduction <add>, %22, %cst_9 [0] : vector<8x256xf32> to vector<256xf32>
    %24 = vector.shape_cast %23 : vector<256xf32> to vector<1x256xf32>
    %25 = tpu.reciprocal %13 : vector<1x256xf32> -> vector<1x256xf32>
    %26 = arith.mulf %24, %25 : vector<1x256xf32>
    %27 = arith.subf %14, %26 : vector<1x256xf32>
    %c0_10 = arith.constant 0 : index
    %c0_11 = arith.constant 0 : index
    %c0_12 = arith.constant 0 : index
    %28 = vector.load %arg4[%c0_10, %c0_11, %c0_12] : memref<1x2x256xf32, #tpu.memory_space<vmem>>, vector<1x1x256xf32>
    %29 = vector.shape_cast %28 : vector<1x1x256xf32> to vector<1x256xf32>
    %30 = arith.addf %29, %21 : vector<1x256xf32>
    %c0_13 = arith.constant 0 : index
    %c0_14 = arith.constant 0 : index
    %c0_15 = arith.constant 0 : index
    %31 = vector.load %arg4[%c0_13, %c0_14, %c0_15] : memref<1x2x256xf32, #tpu.memory_space<vmem>>, vector<1x1x256xf32>
    %32 = vector.shape_cast %31 : vector<1x1x256xf32> to vector<1x256xf32>
    %33 = vector.shape_cast %30 : vector<1x256xf32> to vector<1x1x256xf32>
    tpu.vector_store %arg4[%c0_13, %c0_14, %c0_15], %33 {strides = array<i32>} : memref<1x2x256xf32, #tpu.memory_space<vmem>>, vector<1x1x256xf32>,
    %c0_16 = arith.constant 0 : index
    %c1 = arith.constant 1 : index
    %c0_17 = arith.constant 0 : index
    %34 = vector.load %arg4[%c0_16, %c1, %c0_17] : memref<1x2x256xf32, #tpu.memory_space<vmem>>, vector<1x1x256xf32>
    %35 = vector.shape_cast %34 : vector<1x1x256xf32> to vector<1x256xf32>
    %36 = arith.addf %35, %27 : vector<1x256xf32>
    %c0_18 = arith.constant 0 : index
    %c1_19 = arith.constant 1 : index
    %c0_20 = arith.constant 0 : index
    %37 = vector.load %arg4[%c0_18, %c1_19, %c0_20] : memref<1x2x256xf32, #tpu.memory_space<vmem>>, vector<1x1x256xf32>
    %38 = vector.shape_cast %37 : vector<1x1x256xf32> to vector<1x256xf32>
    %39 = vector.shape_cast %36 : vector<1x256xf32> to vector<1x1x256xf32>
    tpu.vector_store %arg4[%c0_18, %c1_19, %c0_20], %39 {strides = array<i32>} : memref<1x2x256xf32, #tpu.memory_space<vmem>>, vector<1x1x256xf32>,
    return
  }
  func.func @transform_0(%arg0: i32, %arg1: i32) -> (i32, i32, i32) {
    %c0_i32 = arith.constant 0 : i32
    %c0_i32_0 = arith.constant 0 : i32
    return %arg0, %c0_i32, %arg1 : i32, i32, i32
  }
  func.func @transform_1(%arg0: i32, %arg1: i32) -> (i32, i32, i32) {
    %c0_i32 = arith.constant 0 : i32
    %c0_i32_0 = arith.constant 0 : i32
    return %arg0, %c0_i32, %arg1 : i32, i32, i32
  }
  func.func @transform_2(%arg0: i32, %arg1: i32) -> (i32, i32, i32) {
    %c0_i32 = arith.constant 0 : i32
    %c0_i32_0 = arith.constant 0 : i32
    %c0_i32_1 = arith.constant 0 : i32
    return %arg0, %c0_i32, %c0_i32_0 : i32, i32, i32
  }
}

</mosaic_0001>

<bundles_post_ra>
// kernel: picie_loss.1
= control target key start
LH: loop header
LB: loop body
LE: loop exit
PB: predicated region body
PF: predicated region fallthrough
CT: control target
= control target key end

     0   :  { %s520_s9 = smov 0   ;;  %s522_s10 = smov 0   ;;  %s571_s0 = inlined_call_operand.vmem [shape: f32[2,8,256], index: 0, kind: input, shape index: {}]   ;;  %s572_s1 = inlined_call_operand.vmem [shape: f32[2,8,256], index: 1, kind: input, shape index: {}]   ;;  %s573_s2 = inlined_call_operand.vmem [shape: f32[2,2,256], index: 2, kind: output, shape index: {}]  }
   0x1   :  { %s524_s11 = smov 0  }
   0x2 LB: > { %s24_s12 = sadd.s32 1, %s497_s10  ;;  %p427_p0 = scmp.ge.s32.totalorder %s501_s11, 1  ;;  %s501_s11 = sphi %s524_s11, %s12_s11   ;;  %s497_s10 = sphi %s522_s10, %s575_s10   ;;  %s493_s9 = sphi %s520_s9, %s574_s9  }
   0x3   : > { %p26_p1 = scmp.ge.s32.totalorder %s24_s12, 2  ;;  %p148_p2 = scmp.lt.s32.totalorder %s501_s11, 3 }
   0x5   : > { %s577_s12 = smov (%p26_p1, %s24_s12), 0  ;;  %p149_p3 = pnand %p427_p0, %p148_p2 }
   0x6   : > { %p184_p4 = scmp.lt.s32.totalorder (!%p149_p3), %s493_s9, 1  ;;  %v503_v2 = vmov (!%p149_p3), 0.0   ;;  %v504_v45 = vmov (!%p149_p3), 1966171168   ;;  %v296_v47 = vlaneseq (!%p149_p3) }
   0x7   : > { %152 = sbr.rel (%p149_p3) target bundleno = 98 (0x62), region = 28  ;;  %v294_v46 = vunpack.c.l.s4 (!%p149_p3), %v504_v45 }
   0x8   : > { %v297_v57 = vshrl.u32 (!%p149_p3), %v296_v47, 7  ;;  %vm311_vm0 = vcmp.lt.s32.totalorder (!%p149_p3), %v296_v47, 256 }
   0x9   : > { %v295_v56 = vunpack.c.0.s8 (!%p149_p3), %v294_v46 }
   0xe   : > { %s579_s9 = smov (!%p184_p4, %s493_s9), 1 }
   0xf   : > { %s438_s13 = sshll.u32 %s579_s9, 4  ;;  %s440_s14 = sshll.u32 %s579_s9, 2 }
  0x10   : > { %s191_s17 = scalar_lea.vmem %s571_s0, %s438_s13  ;;  %s550_s20 = scalar_lea.vmem %s573_s2, %s440_s14 }
  0x11   : > { %v213_v0 = vld [vmem:[%s191_s17] sm:$0xff]  ;;  %v214_v1 = vld [vmem:[%s191_s17 + $0x8] sm:$0xff]  ;;  %212 = vst [vmem:[%s550_s20] sm:$0xf] %v503_v2  ;;  %s201_s23 = scalar_lea.vmem %s572_s1, %s438_s13 }
  0x12   : > { %v217_v3 = vrot.slane %v213_v0, 4  ;;  %v223_v4 = vrot.slane %v214_v1, 4  ;;  %v215_v54 = vld [vmem:[%s201_s23] sm:$0xff]  ;;  %v216_v59 = vld [vmem:[%s201_s23 + $0x8] sm:$0xff] }
  0x14   : > { %v218_v5 = vmax.f32 %v213_v0, %v217_v3  ;;  %v224_v6 = vmax.f32 %v214_v1, %v223_v4  ;;  %v298_v3 = vsub.s32 %v295_v56, %v297_v57 }
  0x16   : > { %v219_v7 = vrot.slane %v218_v5, 2  ;;  %v225_v8 = vrot.slane %v224_v6, 2 }
  0x18   : > { %v220_v9 = vmax.f32 %v218_v5, %v219_v7  ;;  %v226_v10 = vmax.f32 %v224_v6, %v225_v8 }
  0x1a   : > { %v221_v11 = vrot.slane %v220_v9, 1  ;;  %v227_v12 = vrot.slane %v226_v10, 1 }
  0x1c   : > { %v222_v13 = vmax.f32 %v220_v9, %v221_v11  ;;  %v228_v14 = vmax.f32 %v226_v10, %v227_v12  ;;  %v434_v12 = vld [vmem:[%s550_s20 + $0x1] ss:$2 sm:$0x3] }
  0x1e   : > { %v229_v15 = vsub.f32 %v213_v0, %v222_v13  ;;  %v230_v16 = vsub.f32 %v214_v1, %v228_v14 }
  0x20   : > { %v231_v17 = vmul.f32 1.442695, %v229_v15  ;;  %v233_v18 = vmul.f32 1.442695, %v230_v16 }
  0x22   : > { %467 = vpow2.f32 %v231_v17 }
  0x23   : > { %469 = vpow2.f32 %v233_v18 }
  0x2c   : > { %v468_v19 = vpop.eup %467 }
  0x2d   : > { %v470_v20 = vpop.eup %469  ;;  %v235_v21 = vrot.slane %v468_v19, 4  ;;  %v269_v22 = vmul.f32 %v468_v19, %v229_v15 }
  0x2e   : > { %v241_v23 = vrot.slane %v470_v20, 4  ;;  %v270_v24 = vmul.f32 %v470_v20, %v230_v16 }
  0x2f   : > { %v236_v25 = vadd.f32 %v468_v19, %v235_v21  ;;  %v271_v26 = vrot.slane %v269_v22, 4 }
  0x30   : > { %v242_v27 = vadd.f32 %v470_v20, %v241_v23  ;;  %v277_v28 = vrot.slane %v270_v24, 4 }
  0x31   : > { %v237_v29 = vrot.slane %v236_v25, 2  ;;  %v272_v31 = vadd.f32 %v271_v26, %v269_v22  ;;  %v289_v26 = vld [vmem:[%s550_s20] ss:$2 sm:$0x3] }
  0x32   : > { %v243_v30 = vrot.slane %v242_v27, 2  ;;  %v278_v33 = vadd.f32 %v277_v28, %v270_v24 }
  0x33   : > { %v238_v32 = vadd.f32 %v237_v29, %v236_v25  ;;  %v273_v37 = vrot.slane %v272_v31, 2 }
  0x34   : > { %v244_v34 = vadd.f32 %v243_v30, %v242_v27  ;;  %v279_v39 = vrot.slane %v278_v33, 2 }
  0x35   : > { %v239_v35 = vrot.slane %v238_v32, 1  ;;  %v274_v41 = vadd.f32 %v273_v37, %v272_v31 }
  0x36   : > { %v245_v36 = vrot.slane %v244_v34, 1  ;;  %v280_v42 = vadd.f32 %v279_v39, %v278_v33 }
  0x37   : > { %v240_v38 = vadd.f32 %v239_v35, %v238_v32  ;;  %v275_v43 = vrot.slane %v274_v41, 1 }
  0x38   : > { %v246_v40 = vadd.f32 %v245_v36, %v244_v34  ;;  %v281_v44 = vrot.slane %v280_v42, 1 }
  0x39   : > { %471 = vlog2.f32 %v240_v38  ;;  %v276_v48 = vadd.f32 %v275_v43, %v274_v41 }
  0x3a   : > { %473 = vlog2.f32 %v246_v40  ;;  %v282_v50 = vadd.f32 %v281_v44, %v280_v42 }
  0x3b   : > { %475 = vrcp.f32 %v240_v38 }
  0x3c   : > { %477 = vrcp.f32 %v246_v40 }
  0x43   : > { %v472_v49 = vpop.eup %471 }
  0x44   : > { %v474_v51 = vpop.eup %473  ;;  %v248_v52 = vmul.f32 0.6931472, %v472_v49 }
  0x45   : > { %v476_v53 = vpop.eup %475  ;;  %v250_v55 = vmul.f32 0.6931472, %v474_v51 }
  0x46   : > { %v478_v58 = vpop.eup %477  ;;  %v251_v60 = vsub.f32 %v229_v15, %v248_v52  ;;  %v285_v61 = vmul.f32 %v476_v53, %v276_v48 }
  0x47   : > { %v252_v62 = vsub.f32 %v230_v16, %v250_v55  ;;  %v286_v63 = vmul.f32 %v478_v58, %v282_v50 }
  0x48   : > { %v253_v0 = vmul.f32 %v251_v60, %v215_v54  ;;  %v287_v1 = vsub.f32 %v248_v52, %v285_v61 }
  0x49   : > { %v254_v2 = vmul.f32 %v252_v62, %v216_v59  ;;  %v288_v4 = vsub.f32 %v250_v55, %v286_v63 }
  0x4a   : > { %v255_v5 = vrot.slane %v253_v0, 4 }
  0x4b   : > { %v261_v6 = vrot.slane %v254_v2, 4  ;;  %v318_v7 = vcombine.low %v287_v1, %v288_v4 }
  0x4c   : > { %v256_v8 = vadd.f32 %v255_v5, %v253_v0 }
  0x4d   : > { %v262_v9 = vadd.f32 %v261_v6, %v254_v2  ;;  %v325_v10 = vrot.slane %v318_v7, %v298_v3 }
  0x4e   : > { %v257_v11 = vrot.slane %v256_v8, 2 }
  0x4f   : > { %v263_v13 = vrot.slane %v262_v9, 2  ;;  %v332_v14 = vrot.slane %v325_v10, %v298_v3 }
  0x50   : > { %v258_v15 = vadd.f32 %v257_v11, %v256_v8 }
  0x51   : > { %v264_v16 = vadd.f32 %v263_v13, %v262_v9  ;;  %v334_v17 = vadd.f32 %v434_v12, %v332_v14 }
  0x52   : > { %v259_v18 = vrot.slane %v258_v15, 1 }
  0x53   : > { %v265_v19 = vrot.slane %v264_v16, 1  ;;  %435 = vst.msk [vmem:[%s550_s20 + $0x1] ss:$2 sm:$0x3] %vm311_vm0, %v334_v17 }
  0x54   : > { %v260_v20 = vadd.f32 %v259_v18, %v258_v15 }
  0x55   : > { %v266_v21 = vadd.f32 %v265_v19, %v264_v16 }
  0x56   : > { %v267_v22 = vsub.f32 0.0, %v260_v20 }
  0x57   : > { %v268_v23 = vsub.f32 0.0, %v266_v21 }
  0x59   : > { %v292_v24 = vcombine.low %v267_v22, %v268_v23 }
  0x5b   : > { %v299_v25 = vrot.slane %v292_v24, %v298_v3 }
  0x5d   : > { %v306_v27 = vrot.slane %v299_v25, %v298_v3 }
  0x5f   : > { %v308_v28 = vadd.f32 %v306_v27, %v289_v26 }
  0x61   : > { %313 = vst.msk [vmem:[%s550_s20] ss:$2 sm:$0x3] %vm311_vm0, %v308_v28 }
  0x62 PF: > { %s12_s11 = sadd.s32 1, %s501_s11   ;;  %s574_s9 = smov %s497_s10 }
  0x63   : > { %p9_p5 = scmp.ge.s32.totalorder %s12_s11, 4   ;;  %s575_s10 = smov %s577_s12 }
  0x65   :  { %11 = sbr.rel (!%p9_p5) target bundleno = 2 (0x2), region = 66 }

</bundles_post_ra>
